<compile_context>
chip_gen: v6e
topology: v6e:2x2x1
jax: 0.10.0
libtpu: 0.0.40
codegen_flags: <defaults>
</compile_context>

<pallas_src>
import functools

import jax
import jax.numpy as jnp
from jax import lax
from jax.experimental import pallas as pl
from jax.experimental.pallas import tpu as pltpu


def _pad128(n):
    return -(-int(n) // 128) * 128


def _device_kind():
    try:
        return (jax.devices()[0].device_kind or "").lower()
    except Exception:
        return ""


def _loss_kernel(s_ref, p_ref, n_ref,
                 cs_ref, cp_ref, cs2_ref, cp2_ref,
                 lab_ref,
                 out_ref,
                 acc_ref,
                 *, margin, w1, w2, batch, block_rows, tiles_per_split):
    c = pl.program_id(0)          # split axis (TensorCore-parallel on megacore)
    i = pl.program_id(1)          # batch-tile axis (reduction, "arbitrary")

    @pl.when(i == 0)
    def _init():
        acc_ref[0] = jnp.float32(0.0)

    # Row-validity mask built from the *unclamped* tile index: rows at/past the
    # true batch size (padding of the last partial tile, or whole duplicated
    # clamped tiles) contribute exactly 0.  NOTE: padded rows may hold garbage
    # (even Inf/NaN after exp/log); that is safe because jnp.where is a select,
    # not arithmetic -- do not replace the where with a multiply-by-mask.
    tile_idx = c * tiles_per_split + i
    row0 = tile_idx * block_rows
    local = lax.broadcasted_iota(jnp.int32, (block_rows, 1), 0)
    valid = (row0 + local) < batch                         # (TB, 1) bool

    # nn.PairwiseDistance default: eps is added to the *difference*, not the
    # norm (matches PyTorch; do not "fix" to eps-on-norm).
    eps = jnp.float32(1e-6)
    s = s_ref[...].astype(jnp.float32)
    p = p_ref[...].astype(jnp.float32)
    n = n_ref[...].astype(jnp.float32)

    d = s_ref.shape[-1]
    ones_d = jnp.ones((d, 1), jnp.float32)
    dp = s - p + eps
    dn = s - n + eps
    # Row reductions as tiny matmuls -> MXU (idle otherwise) instead of XLU.
    d_ap = jnp.sqrt(jnp.dot(dp * dp, ones_d, preferred_element_type=jnp.float32))
    d_an = jnp.sqrt(jnp.dot(dn * dn, ones_d, preferred_element_type=jnp.float32))
    hinge = jnp.maximum(d_ap - d_an + jnp.float32(margin), 0.0)       # (TB, 1)
    trip_sum = jnp.sum(jnp.where(valid, hinge, 0.0))

    def ce_sum(logits_ref, onehot, ones_c):
        x = logits_ref[...].astype(jnp.float32)
        m = jnp.max(x, axis=-1, keepdims=True)
        sum_exp = jnp.dot(jnp.exp(x - m), ones_c,
                          preferred_element_type=jnp.float32)
        lse = jnp.log(sum_exp) + m
        tgt = jnp.dot(onehot * x, ones_c, preferred_element_type=jnp.float32)
        return jnp.sum(jnp.where(valid, lse - tgt, 0.0))

    lab = lab_ref[...]                                     # (TB, 2) int32
    lab1 = lab[:, 0:1]
    lab2 = lab[:, 1:2]
    c1 = cs_ref.shape[-1]
    c2 = cs2_ref.shape[-1]
    ones_c1 = jnp.ones((c1, 1), jnp.float32)
    ones_c2 = jnp.ones((c2, 1), jnp.float32)
    # One one-hot per label column, shared by the cs/cp (resp. cs2/cp2) pair.
    onehot1 = (lab1 == lax.broadcasted_iota(jnp.int32, (block_rows, c1), 1)
               ).astype(jnp.float32)
    onehot2 = (lab2 == lax.broadcasted_iota(jnp.int32, (block_rows, c2), 1)
               ).astype(jnp.float32)

    cls1 = ce_sum(cs_ref, onehot1, ones_c1) + ce_sum(cp_ref, onehot1, ones_c1)
    cls2 = ce_sum(cs2_ref, onehot2, ones_c2) + ce_sum(cp2_ref, onehot2, ones_c2)

    acc_ref[0] = (acc_ref[0] + trip_sum
                  + jnp.float32(w1) * cls1 + jnp.float32(w2) * cls2)

    @pl.when(i == pl.num_programs(1) - 1)
    def _finalize():
        out_ref[0, 0, 0] = acc_ref[0]


def triplet_margin_loss_with_classification2(
        s_logits, p_logits, n_logits,
        cs_logits, cp_logits, cs_logits2, cp_logits2,
        labels, labels2,
        margin=1.0, classification_weight=0.25, classification_weight2=0.5,
        block_rows=None):
    B, D = s_logits.shape
    C1 = cs_logits.shape[-1]
    C2 = cs_logits2.shape[-1]

    # Merge the two label vectors into a single (B, 2) int32 sideband: halves
    # the number of worst-efficiency (lane-sparse) DMA streams.  This is tiny
    # (8 bytes/row) so the wrapper-side stack is negligible.
    labels_both = jnp.stack(
        [labels.astype(jnp.int32), labels2.astype(jnp.int32)], axis=-1)

    # ---- chip-aware VMEM budgeting using the *padded* 128-lane footprint ----
    kind = _device_kind()
    is_v7 = ("7x" in kind) or ("v7" in kind)
    two_tensorcores = is_v7 or ("v4" in kind) or ("v5p" in kind)
    try:
        vmem_cap = int(pltpu.get_tpu_info().vmem_capacity_bytes)
    except Exception:
        vmem_cap = 64 * 2**20 if is_v7 else 128 * 2**20

    # Every input's last dim is laid out to a 128-lane multiple in VMEM.
    padded_row_bytes = 4 * (3 * _pad128(D) + 2 * _pad128(C1)
                            + 2 * _pad128(C2) + _pad128(2))

    if is_v7 or vmem_cap < 96 * 2**20:
        input_budget = 24 * 2**20        # double-buffered inputs (per core)
        limit_cap = 40 * 2**20           # of 64 MiB/TC on v7x
    else:
        input_budget = 40 * 2**20        # v5e / v6e: 128 MiB VMEM
        limit_cap = 96 * 2**20

    # ---- batch-tile size ----------------------------------------------------
    if block_rows is None:
        tb = input_budget // (2 * padded_row_bytes)
        tb = max(8, min(4096, tb))
    else:
        tb = max(1, int(block_rows))
    if B <= 8:
        tb = B                           # single full-height block
    else:
        tb = max(8, min((tb // 8) * 8, (B // 8) * 8))

    n_tiles = -(-B // tb)                # cdiv
    nsplit = 2 if (two_tensorcores and n_tiles >= 4) else 1
    tiles_per_split = -(-n_tiles // nsplit)

    def row_map(c, i):
        t = c * tiles_per_split + i
        # Clamp so no fully out-of-bounds block DMA is ever issued; clamped
        # (duplicate) tiles are fully masked out inside the kernel.
        return (jnp.minimum(t, n_tiles - 1), 0)

    kernel = functools.partial(
        _loss_kernel,
        margin=float(margin),
        w1=float(classification_weight),
        w2=float(classification_weight2),
        batch=B, block_rows=tb, tiles_per_split=tiles_per_split)

    in_bytes = 4 * B * (3 * D + 2 * C1 + 2 * C2 + 2)
    cost = pl.CostEstimate(
        flops=int(B * (8 * D + 12 * (C1 + C2))),
        transcendentals=int(B * (2 * (C1 + C2) + 6)),
        bytes_accessed=int(in_bytes + 4 * nsplit))

    # Declared limit covers the double-buffered *padded* input working set plus
    # headroom for compiler-internal scratch / constants.
    vmem_limit = int(min(limit_cap,
                         max(2 * tb * padded_row_bytes + 8 * 2**20,
                             16 * 2**20)))

    partials = pl.pallas_call(
        kernel,
        out_shape=jax.ShapeDtypeStruct((nsplit, 1, 1), jnp.float32),
        grid_spec=pltpu.PrefetchScalarGridSpec(
            num_scalar_prefetch=0,
            grid=(nsplit, tiles_per_split),
            in_specs=[
                pl.BlockSpec((tb, D), row_map),
                pl.BlockSpec((tb, D), row_map),
                pl.BlockSpec((tb, D), row_map),
                pl.BlockSpec((tb, C1), row_map),
                pl.BlockSpec((tb, C1), row_map),
                pl.BlockSpec((tb, C2), row_map),
                pl.BlockSpec((tb, C2), row_map),
                pl.BlockSpec((tb, 2), row_map),
            ],
            out_specs=pl.BlockSpec((1, 1, 1), lambda c, i: (c, 0, 0),
                                   memory_space=pltpu.SMEM),
            scratch_shapes=[pltpu.SMEM((1,), jnp.float32)],
        ),
        compiler_params=pltpu.CompilerParams(
            dimension_semantics=("parallel", "arbitrary"),
            vmem_limit_bytes=vmem_limit),
        cost_estimate=cost,
    )(s_logits, p_logits, n_logits,
      cs_logits, cp_logits, cs_logits2, cp_logits2,
      labels_both)

    # Combine per-split raw sums; divide by the global batch size exactly once.
    return jnp.sum(partials) / jnp.float32(B)


if __name__ == "__main__":
    def reference(s, p, n, cs, cp, cs2, cp2, lab, lab2, margin, w1, w2):
        def ce(x, y):
            return jnp.mean(jax.nn.logsumexp(x, axis=-1)
                            - jnp.take_along_axis(x, y[:, None], axis=-1)[:, 0])
        d_ap = jnp.linalg.norm(s - p + 1e-6, axis=-1)
        d_an = jnp.linalg.norm(s - n + 1e-6, axis=-1)
        trip = jnp.mean(jnp.maximum(d_ap - d_an + margin, 0.0))
        return (trip + w1 * (ce(cs, lab) + ce(cp, lab))
                + w2 * (ce(cs2, lab2) + ce(cp2, lab2)))

    # ---- Test 1: small shapes (single-tile path) ---------------------------
    B, D, C1, C2 = 8, 32, 16, 16
    ks = jax.random.split(jax.random.PRNGKey(0), 9)
    args = (jax.random.normal(ks[0], (B, D), jnp.float32),
            jax.random.normal(ks[1], (B, D), jnp.float32),
            jax.random.normal(ks[2], (B, D), jnp.float32),
            jax.random.normal(ks[3], (B, C1), jnp.float32),
            jax.random.normal(ks[4], (B, C1), jnp.float32),
            jax.random.normal(ks[5], (B, C2), jnp.float32),
            jax.random.normal(ks[6], (B, C2), jnp.float32),
            jax.random.randint(ks[7], (B,), 0, C1, jnp.int32),
            jax.random.randint(ks[8], (B,), 0, C2, jnp.int32))
    loss = triplet_margin_loss_with_classification2(*args, margin=1.0)
    jax.block_until_ready(loss)
    ref = reference(*args, 1.0, 0.25, 0.5)
    assert jnp.allclose(loss, ref, rtol=1e-5, atol=1e-5), (loss, ref)

    # ---- Test 2: larger batch, forced small tiles (partial tiles, masking) -
    B2 = 1000
    ks2 = jax.random.split(jax.random.PRNGKey(1), 9)
    args2 = (jax.random.normal(ks2[0], (B2, D), jnp.float32),
             jax.random.normal(ks2[1], (B2, D), jnp.float32),
             jax.random.normal(ks2[2], (B2, D), jnp.float32),
             jax.random.normal(ks2[3], (B2, C1), jnp.float32),
             jax.random.normal(ks2[4], (B2, C1), jnp.float32),
             jax.random.normal(ks2[5], (B2, C2), jnp.float32),
             jax.random.normal(ks2[6], (B2, C2), jnp.float32),
             jax.random.randint(ks2[7], (B2,), 0, C1, jnp.int32),
             jax.random.randint(ks2[8], (B2,), 0, C2, jnp.int32))
    ref2 = reference(*args2, 0.5, 0.25, 0.5)
    loss2 = triplet_margin_loss_with_classification2(*args2, margin=0.5,
                                                     block_rows=128)
    jax.block_until_ready(loss2)
    assert jnp.allclose(loss2, ref2, rtol=1e-4, atol=1e-4), (loss2, ref2)

    # ---- Test 3: same batch, auto tile sizing (padded-VMEM budget path) ----
    loss3 = triplet_margin_loss_with_classification2(*args2, margin=0.5)
    jax.block_until_ready(loss3)
    assert jnp.allclose(loss3, ref2, rtol=1e-4, atol=1e-4), (loss3, ref2)

    print("KERNEL_OK")
</pallas_src>

<mosaic_0001>
module attributes {stable_mosaic.version = 11 : i64} {
  func.func @_loss_kernel(%arg0: i32, %arg1: i32, %arg2: memref<8x32xf32, #tpu.memory_space<vmem>>, %arg3: memref<8x32xf32, #tpu.memory_space<vmem>>, %arg4: memref<8x32xf32, #tpu.memory_space<vmem>>, %arg5: memref<8x16xf32, #tpu.memory_space<vmem>>, %arg6: memref<8x16xf32, #tpu.memory_space<vmem>>, %arg7: memref<8x16xf32, #tpu.memory_space<vmem>>, %arg8: memref<8x16xf32, #tpu.memory_space<vmem>>, %arg9: memref<8x2xi32, #tpu.memory_space<vmem>>, %arg10: memref<1x1x1xf32, #tpu.memory_space<smem>>, %arg11: memref<1xf32, #tpu.memory_space<smem>>) attributes {dimension_semantics = [#tpu.dimension_semantics<parallel>, #tpu.dimension_semantics<arbitrary>], iteration_bounds = array<i64: 1, 1>, scalar_prefetch = 0 : i64, scratch_operands = 1 : i64, tpu.core_type = #tpu.core_type<tc>, window_params = [{transform_indices = @transform_0, window_bounds = array<i64: 8, 32>}, {transform_indices = @transform_1, window_bounds = array<i64: 8, 32>}, {transform_indices = @transform_2, window_bounds = array<i64: 8, 32>}, {transform_indices = @transform_3, window_bounds = array<i64: 8, 16>}, {transform_indices = @transform_4, window_bounds = array<i64: 8, 16>}, {transform_indices = @transform_5, window_bounds = array<i64: 8, 16>}, {transform_indices = @transform_6, window_bounds = array<i64: 8, 16>}, {transform_indices = @transform_7, window_bounds = array<i64: 8, 2>}, {transform_indices = @transform_8, window_bounds = array<i64: 1, 1, 1>}]} {
    %c0_i32 = arith.constant 0 : i32
    %0 = arith.cmpi eq, %arg1, %c0_i32 : i32
    %1 = arith.extui %0 : i1 to i32
    %c0_i32_0 = arith.constant 0 : i32
    %2 = arith.cmpi ne, %1, %c0_i32_0 : i32
    scf.if %2 {
      %cst_53 = arith.constant 0.000000e+00 : f32
      %c0_54 = arith.constant 0 : index
      %137 = memref.load %arg11[%c0_54] : memref<1xf32, #tpu.memory_space<smem>>
      memref.store %cst_53, %arg11[%c0_54] : memref<1xf32, #tpu.memory_space<smem>>
    } else {
    }
    %c1_i32 = arith.constant 1 : i32
    %3 = arith.muli %arg0, %c1_i32 : i32
    %4 = arith.addi %3, %arg1 : i32
    %c8_i32 = arith.constant 8 : i32
    %5 = arith.muli %4, %c8_i32 : i32
    %6 = tpu.iota {dimensions = array<i32: 0>} : vector<8x1xi32>
    %7 = vector.broadcast %5 : i32 to vector<8x1xi32>
    %8 = arith.addi %7, %6 : vector<8x1xi32>
    %c8_i32_1 = arith.constant 8 : i32
    %9 = vector.broadcast %c8_i32_1 : i32 to vector<8x1xi32>
    %10 = arith.cmpi slt, %8, %9 : vector<8x1xi32>
    %c0 = arith.constant 0 : index
    %c0_2 = arith.constant 0 : index
    %11 = vector.load %arg2[%c0, %c0_2] : memref<8x32xf32, #tpu.memory_space<vmem>>, vector<8x32xf32>
    %c0_3 = arith.constant 0 : index
    %c0_4 = arith.constant 0 : index
    %12 = vector.load %arg3[%c0_3, %c0_4] : memref<8x32xf32, #tpu.memory_space<vmem>>, vector<8x32xf32>
    %c0_5 = arith.constant 0 : index
    %c0_6 = arith.constant 0 : index
    %13 = vector.load %arg4[%c0_5, %c0_6] : memref<8x32xf32, #tpu.memory_space<vmem>>, vector<8x32xf32>
    %cst = arith.constant 1.000000e+00 : f32
    %14 = vector.broadcast %cst : f32 to vector<32x1xf32>
    %15 = arith.subf %11, %12 : vector<8x32xf32>
    %cst_7 = arith.constant 9.99999997E-7 : f32
    %16 = vector.broadcast %cst_7 : f32 to vector<8x32xf32>
    %17 = arith.addf %15, %16 : vector<8x32xf32>
    %18 = arith.subf %11, %13 : vector<8x32xf32>
    %cst_8 = arith.constant 9.99999997E-7 : f32
    %19 = vector.broadcast %cst_8 : f32 to vector<8x32xf32>
    %20 = arith.addf %18, %19 : vector<8x32xf32>
    %21 = arith.mulf %17, %17 : vector<8x32xf32>
    %cst_9 = arith.constant dense<0.000000e+00> : vector<8x1xf32>
    %22 = tpu.matmul %21, %14, %cst_9 {dimension_numbers = #tpu.dot_dimension_numbers<[1], [0], [0], [1], [0, 0, 1, 1], [], []>} : vector<8x32xf32>, vector<32x1xf32>, vector<8x1xf32> -> vector<8x1xf32>
    %23 = math.sqrt %22 : vector<8x1xf32>
    %24 = arith.mulf %20, %20 : vector<8x32xf32>
    %cst_10 = arith.constant dense<0.000000e+00> : vector<8x1xf32>
    %25 = tpu.matmul %24, %14, %cst_10 {dimension_numbers = #tpu.dot_dimension_numbers<[1], [0], [0], [1], [0, 0, 1, 1], [], []>} : vector<8x32xf32>, vector<32x1xf32>, vector<8x1xf32> -> vector<8x1xf32>
    %26 = math.sqrt %25 : vector<8x1xf32>
    %27 = arith.subf %23, %26 : vector<8x1xf32>
    %cst_11 = arith.constant 1.000000e+00 : f32
    %28 = vector.broadcast %cst_11 : f32 to vector<8x1xf32>
    %29 = arith.addf %27, %28 : vector<8x1xf32>
    %cst_12 = arith.constant 0.000000e+00 : f32
    %30 = vector.broadcast %cst_12 : f32 to vector<8x1xf32>
    %31 = arith.maximumf %29, %30 : vector<8x1xf32>
    %cst_13 = arith.constant 0.000000e+00 : f32
    %32 = vector.broadcast %cst_13 : f32 to vector<8x1xf32>
    %33 = arith.select %10, %31, %32 : vector<8x1xi1>, vector<8x1xf32>
    %34 = vector.shape_cast %33 : vector<8x1xf32> to vector<1x8x1xf32>
    %cst_14 = arith.constant dense<0.000000e+00> : vector<1xf32>
    %35 = vector.multi_reduction <add>, %34, %cst_14 [1, 2] : vector<1x8x1xf32> to vector<1xf32>
    %36 = vector.shape_cast %35 : vector<1xf32> to vector<1x1x1xf32>
    %37 = vector.extract %36[0, 0, 0] : f32 from vector<1x1x1xf32>
    %c0_15 = arith.constant 0 : index
    %c0_16 = arith.constant 0 : index
    %38 = vector.load %arg9[%c0_15, %c0_16] : memref<8x2xi32, #tpu.memory_space<vmem>>, vector<8x2xi32>
    %39 = vector.extract_strided_slice %38 {offsets = [0, 0], sizes = [8, 1], strides = [1, 1]} : vector<8x2xi32> to vector<8x1xi32>
    %40 = vector.extract_strided_slice %38 {offsets = [0, 1], sizes = [8, 1], strides = [1, 1]} : vector<8x2xi32> to vector<8x1xi32>
    %cst_17 = arith.constant 1.000000e+00 : f32
    %41 = vector.broadcast %cst_17 : f32 to vector<16x1xf32>
    %cst_18 = arith.constant 1.000000e+00 : f32
    %42 = vector.broadcast %cst_18 : f32 to vector<16x1xf32>
    %43 = tpu.iota {dimensions = array<i32: 1>} : vector<8x16xi32>
    %44 = vector.broadcast %39 : vector<8x1xi32> to vector<8x16xi32>
    %45 = arith.cmpi eq, %44, %43 : vector<8x16xi32>
    %46 = arith.extui %45 : vector<8x16xi1> to vector<8x16xi32>
    %47 = arith.sitofp %46 : vector<8x16xi32> to vector<8x16xf32>
    %48 = tpu.iota {dimensions = array<i32: 1>} : vector<8x16xi32>
    %49 = vector.broadcast %40 : vector<8x1xi32> to vector<8x16xi32>
    %50 = arith.cmpi eq, %49, %48 : vector<8x16xi32>
    %51 = arith.extui %50 : vector<8x16xi1> to vector<8x16xi32>
    %52 = arith.sitofp %51 : vector<8x16xi32> to vector<8x16xf32>
    %c0_19 = arith.constant 0 : index
    %c0_20 = arith.constant 0 : index
    %53 = vector.load %arg5[%c0_19, %c0_20] : memref<8x16xf32, #tpu.memory_space<vmem>>, vector<8x16xf32>
    %cst_21 = arith.constant dense<0xFF800000> : vector<8xf32>
    %54 = vector.multi_reduction <maximumf>, %53, %cst_21 [1] : vector<8x16xf32> to vector<8xf32>
    %55 = vector.shape_cast %54 : vector<8xf32> to vector<8x1xf32>
    %56 = vector.broadcast %55 : vector<8x1xf32> to vector<8x16xf32>
    %57 = arith.subf %53, %56 : vector<8x16xf32>
    %58 = math.exp %57 : vector<8x16xf32>
    %cst_22 = arith.constant dense<0.000000e+00> : vector<8x1xf32>
    %59 = tpu.matmul %58, %41, %cst_22 {dimension_numbers = #tpu.dot_dimension_numbers<[1], [0], [0], [1], [0, 0, 1, 1], [], []>} : vector<8x16xf32>, vector<16x1xf32>, vector<8x1xf32> -> vector<8x1xf32>
    %60 = math.log %59 : vector<8x1xf32>
    %61 = arith.addf %60, %55 : vector<8x1xf32>
    %62 = arith.mulf %47, %53 : vector<8x16xf32>
    %cst_23 = arith.constant dense<0.000000e+00> : vector<8x1xf32>
    %63 = tpu.matmul %62, %41, %cst_23 {dimension_numbers = #tpu.dot_dimension_numbers<[1], [0], [0], [1], [0, 0, 1, 1], [], []>} : vector<8x16xf32>, vector<16x1xf32>, vector<8x1xf32> -> vector<8x1xf32>
    %64 = arith.subf %61, %63 : vector<8x1xf32>
    %cst_24 = arith.constant 0.000000e+00 : f32
    %65 = vector.broadcast %cst_24 : f32 to vector<8x1xf32>
    %66 = arith.select %10, %64, %65 : vector<8x1xi1>, vector<8x1xf32>
    %67 = vector.shape_cast %66 : vector<8x1xf32> to vector<1x8x1xf32>
    %cst_25 = arith.constant dense<0.000000e+00> : vector<1xf32>
    %68 = vector.multi_reduction <add>, %67, %cst_25 [1, 2] : vector<1x8x1xf32> to vector<1xf32>
    %69 = vector.shape_cast %68 : vector<1xf32> to vector<1x1x1xf32>
    %70 = vector.extract %69[0, 0, 0] : f32 from vector<1x1x1xf32>
    %c0_26 = arith.constant 0 : index
    %c0_27 = arith.constant 0 : index
    %71 = vector.load %arg6[%c0_26, %c0_27] : memref<8x16xf32, #tpu.memory_space<vmem>>, vector<8x16xf32>
    %cst_28 = arith.constant dense<0xFF800000> : vector<8xf32>
    %72 = vector.multi_reduction <maximumf>, %71, %cst_28 [1] : vector<8x16xf32> to vector<8xf32>
    %73 = vector.shape_cast %72 : vector<8xf32> to vector<8x1xf32>
    %74 = vector.broadcast %73 : vector<8x1xf32> to vector<8x16xf32>
    %75 = arith.subf %71, %74 : vector<8x16xf32>
    %76 = math.exp %75 : vector<8x16xf32>
    %cst_29 = arith.constant dense<0.000000e+00> : vector<8x1xf32>
    %77 = tpu.matmul %76, %41, %cst_29 {dimension_numbers = #tpu.dot_dimension_numbers<[1], [0], [0], [1], [0, 0, 1, 1], [], []>} : vector<8x16xf32>, vector<16x1xf32>, vector<8x1xf32> -> vector<8x1xf32>
    %78 = math.log %77 : vector<8x1xf32>
    %79 = arith.addf %78, %73 : vector<8x1xf32>
    %80 = arith.mulf %47, %71 : vector<8x16xf32>
    %cst_30 = arith.constant dense<0.000000e+00> : vector<8x1xf32>
    %81 = tpu.matmul %80, %41, %cst_30 {dimension_numbers = #tpu.dot_dimension_numbers<[1], [0], [0], [1], [0, 0, 1, 1], [], []>} : vector<8x16xf32>, vector<16x1xf32>, vector<8x1xf32> -> vector<8x1xf32>
    %82 = arith.subf %79, %81 : vector<8x1xf32>
    %cst_31 = arith.constant 0.000000e+00 : f32
    %83 = vector.broadcast %cst_31 : f32 to vector<8x1xf32>
    %84 = arith.select %10, %82, %83 : vector<8x1xi1>, vector<8x1xf32>
    %85 = vector.shape_cast %84 : vector<8x1xf32> to vector<1x8x1xf32>
    %cst_32 = arith.constant dense<0.000000e+00> : vector<1xf32>
    %86 = vector.multi_reduction <add>, %85, %cst_32 [1, 2] : vector<1x8x1xf32> to vector<1xf32>
    %87 = vector.shape_cast %86 : vector<1xf32> to vector<1x1x1xf32>
    %88 = vector.extract %87[0, 0, 0] : f32 from vector<1x1x1xf32>
    %89 = arith.addf %70, %88 : f32
    %c0_33 = arith.constant 0 : index
    %c0_34 = arith.constant 0 : index
    %90 = vector.load %arg7[%c0_33, %c0_34] : memref<8x16xf32, #tpu.memory_space<vmem>>, vector<8x16xf32>
    %cst_35 = arith.constant dense<0xFF800000> : vector<8xf32>
    %91 = vector.multi_reduction <maximumf>, %90, %cst_35 [1] : vector<8x16xf32> to vector<8xf32>
    %92 = vector.shape_cast %91 : vector<8xf32> to vector<8x1xf32>
    %93 = vector.broadcast %92 : vector<8x1xf32> to vector<8x16xf32>
    %94 = arith.subf %90, %93 : vector<8x16xf32>
    %95 = math.exp %94 : vector<8x16xf32>
    %cst_36 = arith.constant dense<0.000000e+00> : vector<8x1xf32>
    %96 = tpu.matmul %95, %42, %cst_36 {dimension_numbers = #tpu.dot_dimension_numbers<[1], [0], [0], [1], [0, 0, 1, 1], [], []>} : vector<8x16xf32>, vector<16x1xf32>, vector<8x1xf32> -> vector<8x1xf32>
    %97 = math.log %96 : vector<8x1xf32>
    %98 = arith.addf %97, %92 : vector<8x1xf32>
    %99 = arith.mulf %52, %90 : vector<8x16xf32>
    %cst_37 = arith.constant dense<0.000000e+00> : vector<8x1xf32>
    %100 = tpu.matmul %99, %42, %cst_37 {dimension_numbers = #tpu.dot_dimension_numbers<[1], [0], [0], [1], [0, 0, 1, 1], [], []>} : vector<8x16xf32>, vector<16x1xf32>, vector<8x1xf32> -> vector<8x1xf32>
    %101 = arith.subf %98, %100 : vector<8x1xf32>
    %cst_38 = arith.constant 0.000000e+00 : f32
    %102 = vector.broadcast %cst_38 : f32 to vector<8x1xf32>
    %103 = arith.select %10, %101, %102 : vector<8x1xi1>, vector<8x1xf32>
    %104 = vector.shape_cast %103 : vector<8x1xf32> to vector<1x8x1xf32>
    %cst_39 = arith.constant dense<0.000000e+00> : vector<1xf32>
    %105 = vector.multi_reduction <add>, %104, %cst_39 [1, 2] : vector<1x8x1xf32> to vector<1xf32>
    %106 = vector.shape_cast %105 : vector<1xf32> to vector<1x1x1xf32>
    %107 = vector.extract %106[0, 0, 0] : f32 from vector<1x1x1xf32>
    %c0_40 = arith.constant 0 : index
    %c0_41 = arith.constant 0 : index
    %108 = vector.load %arg8[%c0_40, %c0_41] : memref<8x16xf32, #tpu.memory_space<vmem>>, vector<8x16xf32>
    %cst_42 = arith.constant dense<0xFF800000> : vector<8xf32>
    %109 = vector.multi_reduction <maximumf>, %108, %cst_42 [1] : vector<8x16xf32> to vector<8xf32>
    %110 = vector.shape_cast %109 : vector<8xf32> to vector<8x1xf32>
    %111 = vector.broadcast %110 : vector<8x1xf32> to vector<8x16xf32>
    %112 = arith.subf %108, %111 : vector<8x16xf32>
    %113 = math.exp %112 : vector<8x16xf32>
    %cst_43 = arith.constant dense<0.000000e+00> : vector<8x1xf32>
    %114 = tpu.matmul %113, %42, %cst_43 {dimension_numbers = #tpu.dot_dimension_numbers<[1], [0], [0], [1], [0, 0, 1, 1], [], []>} : vector<8x16xf32>, vector<16x1xf32>, vector<8x1xf32> -> vector<8x1xf32>
    %115 = math.log %114 : vector<8x1xf32>
    %116 = arith.addf %115, %110 : vector<8x1xf32>
    %117 = arith.mulf %52, %108 : vector<8x16xf32>
    %cst_44 = arith.constant dense<0.000000e+00> : vector<8x1xf32>
    %118 = tpu.matmul %117, %42, %cst_44 {dimension_numbers = #tpu.dot_dimension_numbers<[1], [0], [0], [1], [0, 0, 1, 1], [], []>} : vector<8x16xf32>, vector<16x1xf32>, vector<8x1xf32> -> vector<8x1xf32>
    %119 = arith.subf %116, %118 : vector<8x1xf32>
    %cst_45 = arith.constant 0.000000e+00 : f32
    %120 = vector.broadcast %cst_45 : f32 to vector<8x1xf32>
    %121 = arith.select %10, %119, %120 : vector<8x1xi1>, vector<8x1xf32>
    %122 = vector.shape_cast %121 : vector<8x1xf32> to vector<1x8x1xf32>
    %cst_46 = arith.constant dense<0.000000e+00> : vector<1xf32>
    %123 = vector.multi_reduction <add>, %122, %cst_46 [1, 2] : vector<1x8x1xf32> to vector<1xf32>
    %124 = vector.shape_cast %123 : vector<1xf32> to vector<1x1x1xf32>
    %125 = vector.extract %124[0, 0, 0] : f32 from vector<1x1x1xf32>
    %126 = arith.addf %107, %125 : f32
    %c0_47 = arith.constant 0 : index
    %127 = memref.load %arg11[%c0_47] : memref<1xf32, #tpu.memory_space<smem>>
    %128 = arith.addf %127, %37 : f32
    %cst_48 = arith.constant 2.500000e-01 : f32
    %129 = arith.mulf %cst_48, %89 : f32
    %130 = arith.addf %128, %129 : f32
    %cst_49 = arith.constant 5.000000e-01 : f32
    %131 = arith.mulf %cst_49, %126 : f32
    %132 = arith.addf %130, %131 : f32
    %c0_50 = arith.constant 0 : index
    %133 = memref.load %arg11[%c0_50] : memref<1xf32, #tpu.memory_space<smem>>
    memref.store %132, %arg11[%c0_50] : memref<1xf32, #tpu.memory_space<smem>>
    %c0_i32_51 = arith.constant 0 : i32
    %134 = arith.cmpi eq, %arg1, %c0_i32_51 : i32
    %135 = arith.extui %134 : i1 to i32
    %c0_i32_52 = arith.constant 0 : i32
    %136 = arith.cmpi ne, %135, %c0_i32_52 : i32
    scf.if %136 {
      %c0_53 = arith.constant 0 : index
      %137 = memref.load %arg11[%c0_53] : memref<1xf32, #tpu.memory_space<smem>>
      %c0_54 = arith.constant 0 : index
      %c0_55 = arith.constant 0 : index
      %c0_56 = arith.constant 0 : index
      %138 = memref.load %arg10[%c0_54, %c0_55, %c0_56] : memref<1x1x1xf32, #tpu.memory_space<smem>>
      memref.store %137, %arg10[%c0_54, %c0_55, %c0_56] : memref<1x1x1xf32, #tpu.memory_space<smem>>
    } else {
    }
    return
  }
  func.func @transform_0(%arg0: i32, %arg1: i32) -> (i32, i32) {
    %c1_i32 = arith.constant 1 : i32
    %0 = arith.muli %arg0, %c1_i32 : i32
    %1 = arith.addi %0, %arg1 : i32
    %c0_i32 = arith.constant 0 : i32
    %2 = arith.minsi %1, %c0_i32 : i32
    %c0_i32_0 = arith.constant 0 : i32
    %c0_i32_1 = arith.constant 0 : i32
    return %2, %c0_i32_0 : i32, i32
  }
  func.func @transform_1(%arg0: i32, %arg1: i32) -> (i32, i32) {
    %c1_i32 = arith.constant 1 : i32
    %0 = arith.muli %arg0, %c1_i32 : i32
    %1 = arith.addi %0, %arg1 : i32
    %c0_i32 = arith.constant 0 : i32
    %2 = arith.minsi %1, %c0_i32 : i32
    %c0_i32_0 = arith.constant 0 : i32
    %c0_i32_1 = arith.constant 0 : i32
    return %2, %c0_i32_0 : i32, i32
  }
  func.func @transform_2(%arg0: i32, %arg1: i32) -> (i32, i32) {
    %c1_i32 = arith.constant 1 : i32
    %0 = arith.muli %arg0, %c1_i32 : i32
    %1 = arith.addi %0, %arg1 : i32
    %c0_i32 = arith.constant 0 : i32
    %2 = arith.minsi %1, %c0_i32 : i32
    %c0_i32_0 = arith.constant 0 : i32
    %c0_i32_1 = arith.constant 0 : i32
    return %2, %c0_i32_0 : i32, i32
  }
  func.func @transform_3(%arg0: i32, %arg1: i32) -> (i32, i32) {
    %c1_i32 = arith.constant 1 : i32
    %0 = arith.muli %arg0, %c1_i32 : i32
    %1 = arith.addi %0, %arg1 : i32
    %c0_i32 = arith.constant 0 : i32
    %2 = arith.minsi %1, %c0_i32 : i32
    %c0_i32_0 = arith.constant 0 : i32
    %c0_i32_1 = arith.constant 0 : i32
    return %2, %c0_i32_0 : i32, i32
  }
  func.func @transform_4(%arg0: i32, %arg1: i32) -> (i32, i32) {
    %c1_i32 = arith.constant 1 : i32
    %0 = arith.muli %arg0, %c1_i32 : i32
    %1 = arith.addi %0, %arg1 : i32
    %c0_i32 = arith.constant 0 : i32
    %2 = arith.minsi %1, %c0_i32 : i32
    %c0_i32_0 = arith.constant 0 : i32
    %c0_i32_1 = arith.constant 0 : i32
    return %2, %c0_i32_0 : i32, i32
  }
  func.func @transform_5(%arg0: i32, %arg1: i32) -> (i32, i32) {
    %c1_i32 = arith.constant 1 : i32
    %0 = arith.muli %arg0, %c1_i32 : i32
    %1 = arith.addi %0, %arg1 : i32
    %c0_i32 = arith.constant 0 : i32
    %2 = arith.minsi %1, %c0_i32 : i32
    %c0_i32_0 = arith.constant 0 : i32
    %c0_i32_1 = arith.constant 0 : i32
    return %2, %c0_i32_0 : i32, i32
  }
  func.func @transform_6(%arg0: i32, %arg1: i32) -> (i32, i32) {
    %c1_i32 = arith.constant 1 : i32
    %0 = arith.muli %arg0, %c1_i32 : i32
    %1 = arith.addi %0, %arg1 : i32
    %c0_i32 = arith.constant 0 : i32
    %2 = arith.minsi %1, %c0_i32 : i32
    %c0_i32_0 = arith.constant 0 : i32
    %c0_i32_1 = arith.constant 0 : i32
    return %2, %c0_i32_0 : i32, i32
  }
  func.func @transform_7(%arg0: i32, %arg1: i32) -> (i32, i32) {
    %c1_i32 = arith.constant 1 : i32
    %0 = arith.muli %arg0, %c1_i32 : i32
    %1 = arith.addi %0, %arg1 : i32
    %c0_i32 = arith.constant 0 : i32
    %2 = arith.minsi %1, %c0_i32 : i32
    %c0_i32_0 = arith.constant 0 : i32
    %c0_i32_1 = arith.constant 0 : i32
    return %2, %c0_i32_0 : i32, i32
  }
  func.func @transform_8(%arg0: i32, %arg1: i32) -> (i32, i32, i32) {
    %c0_i32 = arith.constant 0 : i32
    %c0_i32_0 = arith.constant 0 : i32
    %c0_i32_1 = arith.constant 0 : i32
    return %arg0, %c0_i32, %c0_i32_0 : i32, i32, i32
  }
}

</mosaic_0001>

<bundles_post_ra>
// kernel: tpu_custom_call.1
= control target key start
LH: loop header
LB: loop body
LE: loop exit
PB: predicated region body
PF: predicated region fallthrough
CT: control target
= control target key end

     0   :  { %13 = vsyncpa [#allocation4], 0  ;;  %s1649_s0 = inlined_call_operand.vmem [shape: f32[8,32], index: 0, kind: input, shape index: {}]   ;;  %s1650_s1 = inlined_call_operand.hbm [shape: f32[8,32], index: 1, kind: input, shape index: {}]   ;;  %s1651_s2 = inlined_call_operand.hbm [shape: f32[8,32], index: 2, kind: input, shape index: {}]   ;;  %s1652_s3 = inlined_call_operand.hbm [shape: f32[8,16], index: 3, kind: input, shape index: {}]   ;;  %s1653_s4 = inlined_call_operand.vmem [shape: f32[8,16], index: 4, kind: input, shape index: {}]   ;;  %s1654_s5 = inlined_call_operand.hbm [shape: f32[8,16], index: 5, kind: input, shape index: {}]   ;;  %s1655_s6 = inlined_call_operand.hbm [shape: f32[8,16], index: 6, kind: input, shape index: {}]   ;;  %s1656_s7 = inlined_call_operand.vmem [shape: s32[8,2], index: 7, kind: input, shape index: {}]   ;;  %s1657_s8 = inlined_call_operand.hbm [shape: f32[1,1,1], index: 8, kind: output, shape index: {}]  }
   0x1   :  { %14 = vsyncpa [#allocation7], 0 }
   0x2   :  { %15 = vsyncpa [#allocation10], 0 }
   0x3   :  { %16 = vsyncpa [#allocation5], 0  ;;  %s1443_s27 = smov [#allocation6]   ;;  %s1444_s29 = smov [#allocation9]  }
   0x4   :  { %s55_s28 = sshll.u32 %s1443_s27, 4  ;;  %s97_s30 = sshll.u32 %s1444_s29, 4  ;;  %s56_s28 = int_to_ptr.vmem [resolvable:$true] %s55_s28  ;;  %s98_s30 = int_to_ptr.vmem [resolvable:$true] %s97_s30 }
   0x5   :  { %s1335_s9 = scalar_lea.vmem %s56_s28, 128  ;;  %p1340_p1 = scmp.lt.s32.totalorder %s56_s28, %s56_s28 }
   0x6   :  { %p1336_p0 = scmp.ne.s32.totalorder %s56_s28, %s1335_s9  ;;  %p1341_p2 = scmp.lt.s32.totalorder %s1335_s9, %s1335_s9 }
   0x8   :  { %p1342_p3 = por %p1341_p2, %p1340_p1 }
   0xa   :  { %p1343_p4 = pnand %p1342_p3, %p1336_p0 }
   0xc   :  { %1346 = shalt.err (!%p1343_p4)
}
   0xd   :  { %58 = dma.hbm_to_vmem [thread:$0]  %s1651_s2, 128, %s56_s28, [#allocation7]  }
   0xe   :  { %s1355_s12 = scalar_lea.vmem %s98_s30, 128  ;;  %p1360_p6 = scmp.lt.s32.totalorder %s98_s30, %s98_s30 }
   0xf   :  { %p1356_p5 = scmp.ne.s32.totalorder %s98_s30, %s1355_s12  ;;  %p1361_p7 = scmp.lt.s32.totalorder %s1355_s12, %s1355_s12 }
  0x11   :  { %p1362_p8 = por %p1361_p7, %p1360_p6 }
  0x13   :  { %p1363_p9 = pnand %p1362_p8, %p1356_p5 }
  0x15   :  { %1366 = shalt.err (!%p1363_p9)
}
  0x16   :  { %100 = dma.hbm_to_vmem [thread:$0]  %s1654_s5, 128, %s98_s30, [#allocation10]  }
  0x17   :  { %s1445_s15 = smov [#allocation3]   ;;  %s1446_s17 = smov [#allocation8]  }
  0x18   :  { %s40_s16 = sshll.u32 %s1445_s15, 4  ;;  %s70_s18 = sshll.u32 %s1446_s17, 4  ;;  %s41_s16 = int_to_ptr.vmem [resolvable:$true] %s40_s16  ;;  %s71_s18 = int_to_ptr.vmem [resolvable:$true] %s70_s18 }
  0x19   :  { %s1375_s19 = scalar_lea.vmem %s41_s16, 128  ;;  %p1380_p11 = scmp.lt.s32.totalorder %s41_s16, %s41_s16 }
  0x1a   :  { %p1376_p10 = scmp.ne.s32.totalorder %s41_s16, %s1375_s19  ;;  %p1381_p12 = scmp.lt.s32.totalorder %s1375_s19, %s1375_s19 }
  0x1c   :  { %p1382_p13 = por %p1381_p12, %p1380_p11 }
  0x1e   :  { %p1383_p0 = pnand %p1382_p13, %p1376_p10 }
  0x20   :  { %1386 = shalt.err (!%p1383_p0)
}
  0x21   :  { %43 = dma.hbm_to_vmem [thread:$0]  %s1650_s1, 128, %s41_s16, [#allocation4]  }
  0x22   :  { %s1395_s21 = scalar_lea.vmem %s71_s18, 128  ;;  %p1400_p2 = scmp.lt.s32.totalorder %s71_s18, %s71_s18 }
  0x23   :  { %p1396_p1 = scmp.ne.s32.totalorder %s71_s18, %s1395_s21  ;;  %p1401_p3 = scmp.lt.s32.totalorder %s1395_s21, %s1395_s21 }
  0x25   :  { %p1402_p4 = por %p1401_p3, %p1400_p2 }
  0x27   :  { %p1403_p5 = pnand %p1402_p4, %p1396_p1 }
  0x29   :  { %1406 = shalt.err (!%p1403_p5)
}
  0x2a   :  { %73 = dma.hbm_to_vmem [thread:$0]  %s1652_s3, 128, %s71_s18, [#allocation7]  }
  0x2b   :  { %s1447_s23 = smov [#allocation11]  }
  0x2c   :  { %s112_s24 = sshll.u32 %s1447_s23, 4  ;;  %s113_s24 = int_to_ptr.vmem [resolvable:$true] %s112_s24 }
  0x2d   :  { %s1415_s25 = scalar_lea.vmem %s113_s24, 128  ;;  %p1420_p7 = scmp.lt.s32.totalorder %s113_s24, %s113_s24 }
  0x2e   :  { %p1416_p6 = scmp.ne.s32.totalorder %s113_s24, %s1415_s25  ;;  %p1421_p8 = scmp.lt.s32.totalorder %s1415_s25, %s1415_s25 }
  0x30   :  { %p1422_p9 = por %p1421_p8, %p1420_p7 }
  0x32   :  { %p1423_p10 = pnand %p1422_p9, %p1416_p6 }
  0x34   :  { %1426 = shalt.err (!%p1423_p10)
}
  0x35   :  { %115 = dma.hbm_to_vmem [thread:$0]  %s1655_s6, 128, %s113_s24, [#allocation10]  }
  0x36   :  { %1435 = dma.done.wait [#allocation4], 128  }
  0x37   :  { %1436 = vsyncadd [#allocation4], 4294967168 }
  0x38   :  { %1437 = dma.done.wait [#allocation7], 256  }
  0x39   :  { %1438 = vsyncadd [#allocation7], 4294967040 }
  0x3a   :  { %1439 = dma.done.wait [#allocation10], 256  }
  0x3b   :  { %1440 = vsyncadd [#allocation10], 4294967040  ;;  %v1448_v0 = vmov 0   ;;  %v1449_v1 = vmov 1   ;;  %v1450_v2 = vmov 0.0   ;;  %v1451_v3 = vmov 1.0  }
  0x3c   :  { %1304 = vset.pattern.permute.xlu0 %v1448_v0  ;;  %1305 = vset.pattern.permute.xlu1 %v1449_v1  ;;  %vm423_vm0 = vcmask 130048   ;;  %v1524_v4 = vld [vmem:[#allocation8] sm:$0xff]  ;;  %v1529_v5 = vld [vmem:[%s1653_s4] sm:$0xff]  ;;  %v1531_v6 = vld [vmem:[#allocation9] sm:$0xff]  ;;  %vm1452_vm1 = vmmov 0   ;;  %vm230_vm2 = vcmask 261120   ;;  %v408_v30 = vlaneseq }
  0x3d   :  { %1205 = vmatprep.subr.mxu0 %v1450_v2  ;;  %1216 = vmatprep.subr.mxu1 %v1450_v2  ;;  %v424_v7 = vsel %vm423_vm0, %v1524_v4, -inf  ;;  %v763_v8 = vsel %vm423_vm0, %v1531_v6, -inf  ;;  %v1539_v9 = vld [vmem:[#allocation11] sm:$0xff]  ;;  %v224_v12 = vld [vmem:[#allocation6] sm:$0xff]  ;;  %v593_v13 = vsel %vm423_vm0, %v1529_v5, -inf  ;;  %vm396_vm9 = vcmask 7168  }
  0x3e   :  { %1206 = vmatpush3.msra.mxu0 %v1451_v3  ;;  %1217 = vmatpush3.msra.mxu1 %v1451_v3  ;;  %v222_v10 = vld [vmem:[%s1649_s0] sm:$0xff]  ;;  %v932_v14 = vsel %vm423_vm0, %v1539_v9, -inf  ;;  %v409_v34 = vand.u32 127, %v408_v30  ;;  %s1453_s17 = smov [#allocation12]  }
  0x3f   :  { %1207 = vmatprep.subr.mxu0 %v1450_v2  ;;  %1218 = vmatprep.subr.mxu1 %v1450_v2  ;;  %v223_v11 = vld [vmem:[#allocation3] sm:$0xff]  ;;  %v227_v16 = vsub.f32 %v222_v10, %v224_v12 }
  0x40   :  { %1208 = vmatpush3.msra.mxu0 %v1451_v3  ;;  %1219 = vmatpush3.msra.mxu1 %v1451_v3  ;;  %v225_v15 = vsub.f32 %v222_v10, %v223_v11  ;;  %v407_v21 = vld [vmem:[%s1656_s7] sm:$0xff] }
  0x41   :  { %1209 = vmatprep.subr.mxu0 %v1450_v2  ;;  %1220 = vmatprep.subr.mxu1 %v1450_v2  ;;  %v228_v18 = vadd.f32 1e-06, %v227_v16 }
  0x42   :  { %1210 = vmatpush3.msra.mxu0 %v1451_v3  ;;  %1221 = vmatpush3.msra.mxu1 %v1451_v3  ;;  %v226_v17 = vadd.f32 1e-06, %v225_v15 }
  0x43   :  { %1211 = vmatprep.subr.mxu0 %v1450_v2  ;;  %1222 = vmatprep.subr.mxu1 %v1450_v2  ;;  %v311_v20 = vmul.f32 %v228_v18, %v228_v18 }
  0x44   :  { %425 = vmax.xlane.f32.xlu0 %v424_v7  ;;  %764 = vmax.xlane.f32.xlu1 %v763_v8  ;;  %v229_v19 = vmul.f32 %v226_v17, %v226_v17 }
  0x45   :  { %1212 = vmatpush3.msra.mxu0 %v1451_v3  ;;  %1213 = vmatprep.mubr.msk.f32.mxu0 %vm1452_vm1, %v1450_v2 }
  0x46   :  { %1223 = vmatpush3.msra.mxu1 %v1451_v3  ;;  %1224 = vmatprep.mubr.msk.f32.mxu1 %vm1452_vm1, %v1450_v2 }
  0x47   :  { %1227 = vmatprep.subr.mxu0 %v1450_v2  ;;  %1234 = vmatprep.subr.mxu1 %v1450_v2 }
  0x48   :  { %594 = vmax.xlane.f32.xlu0 %v593_v13  ;;  %933 = vmax.xlane.f32.xlu1 %v932_v14 }
  0x49   :  { %1214 = vmatmul.mubr.msk.f32.vlgmr.msra.gmra.mxu0 %vm230_vm2, %v229_v19  ;;  %1225 = vmatmul.mubr.msk.f32.vlgmr.msra.gmra.mxu1 %vm230_vm2, %v311_v20 }
  0x4a   :  { %1228 = vmatpush3.msra.mxu0 %v1451_v3  ;;  %1231 = vmatprep.mubr.msk.f32.mxu0 %vm1452_vm1, %v1450_v2 }
  0x4b   :  { %1229 = vmatprep.subr.mxu0 %v1450_v2  ;;  %1235 = vmatpush3.msra.mxu1 %v1451_v3 }
  0x4c   :  { %1230 = vmatpush3.msra.mxu0 %v1451_v3  ;;  %1236 = vmatprep.subr.mxu1 %v1450_v2 }
  0x4d   :  { %1241 = vmatprep.subr.mxu0 %v1450_v2  ;;  %1237 = vmatpush3.msra.mxu1 %v1451_v3 }
  0x4e   :  { %1238 = vmatprep.mubr.msk.f32.mxu1 %vm1452_vm1, %v1450_v2  ;;  %1248 = vmatprep.subr.mxu1 %v1450_v2 }
  0x59   :  { %417 = vperm.xlu1 %1305, %v407_v21  }
  0x5e   :  { %411 = vperm.xlu0 %1304, %v407_v21  }
  0x62   :  { %1306 = vset.pattern.permute.xlu0 %v1449_v1 }
  0xcd   :  { %v1573_v22 = vpop.xlane.xlu0 %425  ;;  %v1575_v23 = vpop.xlane.xlu1 %764 }
  0xce   :  { %v427_v24 = vsub.f32 %v1524_v4, %v1573_v22  ;;  %v766_v26 = vsub.f32 %v1531_v6, %v1575_v23 }
  0xd0   :  { %v428_v25 = vmul.f32 1.442695, %v427_v24  ;;  %v767_v32 = vmul.f32 1.442695, %v766_v26 }
  0xd1   :  { %v1581_v27 = vpop.xlane.xlu0 %594  ;;  %v1583_v28 = vpop.xlane.xlu1 %933 }
  0xd2   :  { %1307 = vpow2.f32 %v428_v25  ;;  %v596_v29 = vsub.f32 %v1529_v5, %v1581_v27  ;;  %v935_v33 = vsub.f32 %v1539_v9, %v1583_v28 }
  0xd4   :  { %v597_v31 = vmul.f32 1.442695, %v596_v29  ;;  %v936_v35 = vmul.f32 1.442695, %v935_v33 }
  0xd5   :  { %v418_v41 = vpop.permute.xlu1 %417 }
  0xd6   :  { %1309 = vpow2.f32 %v597_v31  ;;  %vm419_vm4 = vcmp.eq.s32.totalorder %v418_v41, %v409_v34 }
  0xd7   :  { %1311 = vpow2.f32 %v767_v32  ;;  %v1162_v44 = vsel %vm419_vm4, 1.0, %v1450_v2 }
  0xd8   :  { %1313 = vpow2.f32 %v936_v35  ;;  %v845_v46 = vmul.f32 %v1162_v44, %v1531_v6  ;;  %v1014_v47 = vmul.f32 %v1162_v44, %v1539_v9 }
  0xd9   :  { %v412_v36 = vpop.permute.xlu0 %411 }
  0xda   :  { %vm413_vm3 = vcmp.eq.s32.totalorder %v412_v36, %v409_v34 }
  0xdb   :  { %v1161_v37 = vsel %vm413_vm3, 1.0, %v1450_v2 }
  0xdc   :  { %v506_v38 = vmul.f32 %v1161_v37, %v1524_v4  ;;  %v675_v40 = vmul.f32 %v1161_v37, %v1529_v5 }
  0xde   :  { %1239 = vmatmul.mubr.msk.f32.vlgmr.msra.gmra.mxu1 %vm423_vm0, %v506_v38 }
  0xdf   :  { %v1308_v39 = vpop.eup %1307  ;;  %1249 = vmatpush3.msra.mxu1 %v1451_v3  ;;  %1252 = vmatprep.mubr.msk.f32.mxu1 %vm1452_vm1, %v1450_v2 }
  0xe0   :  { %1232 = vmatmul.mubr.msk.f32.vlgmr.msra.gmra.mxu0 %vm423_vm0, %v1308_v39  ;;  %1250 = vmatprep.subr.mxu1 %v1450_v2 }
  0xe1   :  { %1242 = vmatpush3.msra.mxu0 %v1451_v3  ;;  %1245 = vmatprep.mubr.msk.f32.mxu0 %vm1452_vm1, %v1450_v2 }
  0xe2   :  { %1243 = vmatprep.subr.mxu0 %v1450_v2  ;;  %1251 = vmatpush3.msra.mxu1 %v1451_v3 }
  0xe3   :  { %v1310_v42 = vpop.eup %1309  ;;  %1244 = vmatpush3.msra.mxu0 %v1451_v3  ;;  %1253 = vmatmul.mubr.msk.f32.vlgmr.msra.gmra.mxu1 %vm423_vm0, %v675_v40 }
  0xe4   :  { %1255 = vmatprep.subr.mxu0 %v1450_v2  ;;  %1246 = vmatmul.mubr.msk.f32.vlgmr.msra.gmra.mxu0 %vm423_vm0, %v1310_v42  ;;  %v1312_v43 = vpop.eup %1311 }
  0xe5   :  { %1256 = vmatpush3.msra.mxu0 %v1451_v3  ;;  %1259 = vmatprep.mubr.msk.f32.mxu0 %vm1452_vm1, %v1450_v2  ;;  %v1314_v45 = vpop.eup %1313 }
  0xe6   :  { %1257 = vmatprep.subr.mxu0 %v1450_v2  ;;  %1262 = vmatprep.subr.mxu1 %v1450_v2 }
  0xe7   :  { %1258 = vmatpush3.msra.mxu0 %v1451_v3  ;;  %1263 = vmatpush3.msra.mxu1 %v1451_v3 }
  0xe8   :  { %1269 = vmatprep.subr.mxu0 %v1450_v2  ;;  %1260 = vmatmul.mubr.msk.f32.vlgmr.msra.gmra.mxu0 %vm423_vm0, %v1312_v43 }
  0xe9   :  { %1270 = vmatpush3.msra.mxu0 %v1451_v3  ;;  %1273 = vmatprep.mubr.msk.f32.mxu0 %vm1452_vm1, %v1450_v2 }
  0xea   :  { %1271 = vmatprep.subr.mxu0 %v1450_v2  ;;  %1264 = vmatprep.subr.mxu1 %v1450_v2 }
  0xeb   :  { %1272 = vmatpush3.msra.mxu0 %v1451_v3  ;;  %1265 = vmatpush3.msra.mxu1 %v1451_v3 }
  0xec   :  { %1274 = vmatmul.mubr.msk.f32.vlgmr.msra.gmra.mxu0 %vm423_vm0, %v1314_v45  ;;  %1266 = vmatprep.mubr.msk.f32.mxu1 %vm1452_vm1, %v1450_v2 }
  0xed   :  { %1267 = vmatmul.mubr.msk.f32.vlgmr.msra.gmra.mxu1 %vm423_vm0, %v845_v46  ;;  %1276 = vmatprep.subr.mxu1 %v1450_v2 }
  0xee   :  { %1277 = vmatpush3.msra.mxu1 %v1451_v3  ;;  %1280 = vmatprep.mubr.msk.f32.mxu1 %vm1452_vm1, %v1450_v2 }
  0xef   :  { %1278 = vmatprep.subr.mxu1 %v1450_v2 }
  0xf0   :  { %1279 = vmatpush3.msra.mxu1 %v1451_v3 }
  0xf1   :  { %1281 = vmatmul.mubr.msk.f32.vlgmr.msra.gmra.mxu1 %vm423_vm0, %v1014_v47 }
 0x109   :  { %v300_v48 = vpop.f32.mrf.mxu0  ;;  %v381_v49 = vpop.f32.mrf.mxu1 }
 0x10a   :  { %1315 = vrsqrt.f32 %v300_v48  ;;  %vm306_vm5 = vcmp.eq.f32.partialorder %v300_v48, inf  ;;  %v309_v53 = vand.u32 2147483648, %v300_v48  ;;  %vm308_vm6 = vcmp.eq.f32.partialorder %v300_v48, 0.0 }
 0x10b   :  { %1317 = vrsqrt.f32 %v381_v49  ;;  %v1215_v50 = vpop.f32.mrf.mxu0  ;;  %v1226_v51 = vpop.f32.mrf.mxu1  ;;  %vm387_vm7 = vcmp.eq.f32.partialorder %v381_v49, inf  ;;  %v390_v56 = vand.u32 2147483648, %v381_v49  ;;  %vm389_vm8 = vcmp.eq.f32.partialorder %v381_v49, 0.0 }
 0x117   :  { %v1316_v52 = vpop.eup %1315 }
 0x118   :  { %v1318_v54 = vpop.eup %1317  ;;  %v305_v55 = vmul.f32 %v1316_v52, %v300_v48 }
 0x119   :  { %v386_v57 = vmul.f32 %v1318_v54, %v381_v49 }
 0x11a   :  { %v307_v58 = vsel %vm306_vm5, %v300_v48, %v305_v55 }
 0x11b   :  { %v310_v59 = vsel %vm308_vm6, %v309_v53, %v307_v58  ;;  %v388_v60 = vsel %vm387_vm7, %v381_v49, %v386_v57 }
 0x11c   :  { %v391_v61 = vsel %vm389_vm8, %v390_v56, %v388_v60 }
 0x11d   :  { %v392_v62 = vsub.f32 %v310_v59, %v391_v61 }
 0x11f   :  { %v393_v63 = vadd.f32 1.0, %v392_v62 }
 0x121   :  { %v394_v0 = vmax.f32 %v393_v63, 0.0 }
 0x123   :  { %v397_v1 = vsel %vm396_vm9, %v394_v0, 0.0 }
 0x124   :  { %398 = vadd.xlane.f32.xlu1 %v397_v1 }
 0x19e   :  { %v576_v2 = vpop.f32.mrf.mxu1 }
 0x1a0   :  { %v499_v3 = vpop.f32.mrf.mxu0  ;;  %v1240_v4 = vpop.f32.mrf.mxu1 }
 0x1a1   :  { %1319 = vlog2.f32 %v499_v3 }
 0x1a2   :  { %v1233_v5 = vpop.f32.mrf.mxu0 }
 0x1a3   :  { %v745_v6 = vpop.f32.mrf.mxu1 }
 0x1a4   :  { %v668_v7 = vpop.f32.mrf.mxu0 }
 0x1a5   :  { %1321 = vlog2.f32 %v668_v7  ;;  %v1254_v8 = vpop.f32.mrf.mxu1 }
 0x1a6   :  { %v1247_v9 = vpop.f32.mrf.mxu0 }
 0x1a8   :  { %v838_v10 = vpop.f32.mrf.mxu0 }
 0x1a9   :  { %1323 = vlog2.f32 %v838_v10 }
 0x1aa   :  { %v1261_v11 = vpop.f32.mrf.mxu0 }
 0x1ac   :  { %v1007_v12 = vpop.f32.mrf.mxu0 }
 0x1ad   :  { %1325 = vlog2.f32 %v1007_v12  ;;  %v915_v13 = vpop.f32.mrf.mxu1  ;;  %v399_v18 = vpop.xlane.xlu1 %398 }
 0x1ae   :  { %v1320_v14 = vpop.eup %1319  ;;  %v1275_v15 = vpop.f32.mrf.mxu0  ;;  %v400_v19 = vrot.slane %v399_v18, 4 }
 0x1af   :  { %v504_v16 = vmul.f32 0.6931472, %v1320_v14  ;;  %v1268_v17 = vpop.f32.mrf.mxu1 }
 0x1b0   :  { %v401_v25 = vadd.f32 %v400_v19, %v399_v18 }
 0x1b1   :  { %v505_v20 = vadd.f32 %v504_v16, %v1573_v22  ;;  %v1084_v21 = vpop.f32.mrf.mxu1 }
 0x1b2   :  { %v1322_v24 = vpop.eup %1321  ;;  %v402_v31 = vrot.slane %v401_v25, 2 }
 0x1b3   :  { %v673_v26 = vmul.f32 0.6931472, %v1322_v24  ;;  %v580_v29 = vsub.f32 %v505_v20, %v576_v2  ;;  %v1282_v30 = vpop.f32.mrf.mxu1 }
 0x1b4   :  { %v403_v35 = vadd.f32 %v402_v31, %v401_v25 }
 0x1b5   :  { %v674_v32 = vadd.f32 %v673_v26, %v1581_v27  ;;  %v582_v33 = vsel %vm396_vm9, %v580_v29, 0.0 }
 0x1b6   :  { %v1324_v34 = vpop.eup %1323  ;;  %583 = vadd.xlane.f32.xlu0 %v582_v33  ;;  %v404_v38 = vrot.slane %v403_v35, 1 }
 0x1b7   :  { %v843_v36 = vmul.f32 0.6931472, %v1324_v34  ;;  %v749_v37 = vsub.f32 %v674_v32, %v745_v6 }
 0x1b8   :  { %v405_v41 = vadd.f32 %v404_v38, %v403_v35 }
 0x1b9   :  { %v844_v39 = vadd.f32 %v843_v36, %v1575_v23  ;;  %v751_v22 = vsel %vm396_vm9, %v749_v37, 0.0 }
 0x1ba   :  { %v1326_v40 = vpop.eup %1325  ;;  %752 = vadd.xlane.f32.xlu1 %v751_v22  ;;  %1283 = vpush %v405_v41 }
 0x1bb   :  { %v1012_v42 = vmul.f32 0.6931472, %v1326_v40  ;;  %v919_v43 = vsub.f32 %v844_v39, %v915_v13 }
 0x1bd   :  { %v1013_v27 = vadd.f32 %v1012_v42, %v1583_v28  ;;  %v921_v44 = vsel %vm396_vm9, %v919_v43, 0.0 }
 0x1be   :  { %922 = vadd.xlane.f32.xlu1 %v921_v44 }
 0x1bf   :  { %v1088_v45 = vsub.f32 %v1013_v27, %v1084_v21 }
 0x1c1   :  { %v1090_v46 = vsel %vm396_vm9, %v1088_v45, 0.0 }
 0x1c2   :  { %1091 = vadd.xlane.f32.xlu1 %v1090_v46 }
 0x1eb   :  { %s1284_s7 = spop %1283 }
 0x23f   :  { %v584_v47 = vpop.xlane.xlu0 %583 }
 0x240   :  { %v585_v48 = vrot.slane %v584_v47, 4 }
 0x242   :  { %v586_v23 = vadd.f32 %v585_v48, %v584_v47 }
 0x243   :  { %v753_v49 = vpop.xlane.xlu1 %752 }
 0x244   :  { %v587_v50 = vrot.slane %v586_v23, 2  ;;  %v754_v51 = vrot.slane %v753_v49, 4 }
 0x246   :  { %v588_v52 = vadd.f32 %v587_v50, %v586_v23  ;;  %v755_v53 = vadd.f32 %v754_v51, %v753_v49 }
 0x247   :  { %v923_v54 = vpop.xlane.xlu1 %922 }
 0x248   :  { %v756_v55 = vrot.slane %v755_v53, 2  ;;  %v924_v56 = vrot.slane %v923_v54, 4  ;;  %v589_v57 = vrot.slane %v588_v52, 1 }
 0x24a   :  { %v925_v28 = vadd.f32 %v924_v56, %v923_v54  ;;  %v590_v58 = vadd.f32 %v589_v57, %v588_v52  ;;  %v757_v59 = vadd.f32 %v756_v55, %v755_v53 }
 0x24b   :  { %v1092_v60 = vpop.xlane.xlu1 %1091 }
 0x24c   :  { %v926_v61 = vrot.slane %v925_v28, 2  ;;  %v1093_v62 = vrot.slane %v1092_v60, 4  ;;  %1285 = vpush %v590_v58  ;;  %v758_v63 = vrot.slane %v757_v59, 1 }
 0x24e   :  { %v1094_v0 = vadd.f32 %v1093_v62, %v1092_v60  ;;  %v759_v1 = vadd.f32 %v758_v63, %v757_v59  ;;  %v927_v2 = vadd.f32 %v926_v61, %v925_v28 }
 0x250   :  { %v1095_v3 = vrot.slane %v1094_v0, 2  ;;  %1287 = vpush %v759_v1  ;;  %v928_v4 = vrot.slane %v927_v2, 1 }
 0x252   :  { %v1096_v5 = vadd.f32 %v1095_v3, %v1094_v0  ;;  %v929_v6 = vadd.f32 %v928_v4, %v927_v2 }
 0x254   :  { %1289 = vpush %v929_v6  ;;  %v1097_v7 = vrot.slane %v1096_v5, 1 }
 0x256   :  { %v1098_v8 = vadd.f32 %v1097_v7, %v1096_v5 }
 0x258   :  { %1291 = vpush %v1098_v8 }
 0x27d   :  { %s1286_s29 = spop %1285 }
 0x281   :  { %s1288_s30 = spop %1287 }
 0x282   :  { %s761_s9 = sadd.f32 %s1288_s30, %s1286_s29 }
 0x284   :  { %s1103_s10 = smul.f32 0.25, %s761_s9 }
 0x285   :  { %s1290_s11 = spop %1289 }
 0x286   :  { %s1104_s14 = sadd.f32 %s1284_s7, %s1103_s10 }
 0x289   :  { %s1292_s12 = spop %1291 }
 0x28a   :  { %s1100_s13 = sadd.f32 %s1292_s12, %s1290_s11 }
 0x28c   :  { %s1105_s15 = smul.f32 0.5, %s1100_s13 }
 0x28e   :  { %s1106_s16 = sadd.f32 %s1105_s15, %s1104_s14 }
 0x290   :  { %1114 = sst [smem:[#allocation12]] %s1106_s16 }
 0x291   :  { %1122 = dma.smem_to_hbm %s1453_s17, 16, %s1657_s8, [#allocation5]  }
 0x292   :  { %1441 = dma.done.wait [#allocation5], 16  }
 0x293   :  { %1442 = vsyncadd [#allocation5], 4294967280 }
 0x294   :  { %1126 = sfence }
 0x295   :  { %1127 = vsyncpa [#allocation4], 1 }
 0x296   :  { %1128 = vsyncpa [#allocation7], 1 }
 0x297   :  { %1129 = vsyncpa [#allocation10], 1 }
 0x298   :  { %1130 = vsyncpa [#allocation5], 1 }

</bundles_post_ra>
